<compile_context>
chip_gen: v6e
topology: v6e:2x2x1
jax: 0.10.0
libtpu: 0.0.40
codegen_flags: <defaults>
</compile_context>

<pallas_src>
import functools

import numpy as np
import jax
import jax.numpy as jnp
from jax.experimental import pallas as pl
from jax.experimental.pallas import tpu as pltpu


# ----------------------------------------------------------------------------
# Pallas kernel: both crops cropped + resized inside ONE kernel launch.
#   img_ref  : (C, H, W)        full image, VMEM resident
#   a*_t_ref : (C, crop, out)   A^T broadcast over channels (width pass)
#   a*_ref   : (C, out, crop)   A   broadcast over channels (height pass)
#   o*_ref   : (C, out, out)    resized crop
# ----------------------------------------------------------------------------
def _multicrop_kernel(img_ref, al_t_ref, al_ref, as_t_ref, as_ref,
                      ol_ref, os_ref, *, crop_l, crop_s,
                      top_l, left_l, top_s, left_s):
    def _crop_resize(top, left, crop, a_t_ref, a_ref, o_ref):
        # Static center-crop window (offsets/sizes are Python ints).
        x = img_ref[:, top:top + crop, left:left + crop]        # (C, crop, crop)
        # Width pass:  t[c, iy, ox] = sum_ix x[c, iy, ix] * A[ox, ix]
        t = jnp.einsum("cyx,cxo->cyo", x, a_t_ref[...],
                       precision=jax.lax.Precision.DEFAULT,
                       preferred_element_type=jnp.float32)
        # Height pass: y[c, oy, ox] = sum_iy A[oy, iy] * t[c, iy, ox]
        y = jnp.einsum("cji,cio->cjo", a_ref[...], t,
                       precision=jax.lax.Precision.DEFAULT,
                       preferred_element_type=jnp.float32)
        o_ref[...] = y.astype(o_ref.dtype)

    _crop_resize(top_l, left_l, crop_l, al_t_ref, al_ref, ol_ref)
    _crop_resize(top_s, left_s, crop_s, as_t_ref, as_ref, os_ref)


# ----------------------------------------------------------------------------
# Static glue: bilinear interpolation matrices (align_corners=False,
# half-pixel centers, edge clamp — PyTorch bilinear upsample convention; all
# crops here are upsampled so the antialias flag of torchvision is a no-op).
# ----------------------------------------------------------------------------
def _bilinear_matrix(in_size: int, out_size: int) -> np.ndarray:
    i = np.arange(out_size, dtype=np.float64)
    src = (i + 0.5) * (in_size / out_size) - 0.5
    src = np.clip(src, 0.0, None)
    i0 = np.clip(np.floor(src).astype(np.int64), 0, in_size - 1)
    i1 = np.minimum(i0 + 1, in_size - 1)
    frac = src - i0
    w = np.zeros((out_size, in_size), dtype=np.float64)
    np.add.at(w, (np.arange(out_size), i0), 1.0 - frac)
    np.add.at(w, (np.arange(out_size), i1), frac)
    return w


@functools.lru_cache(maxsize=None)
def _resize_weights(in_size: int, out_size: int, channels: int):
    # Separable bilinear weights, broadcast over channels so both resize
    # stages are plain batched (c,m,k)x(c,k,n) matmuls inside the kernel.
    a = _bilinear_matrix(in_size, out_size).astype(np.float32)      # (out, in)
    a_t = np.ascontiguousarray(a.T)                                  # (in, out)
    a_t_b = np.ascontiguousarray(np.broadcast_to(a_t, (channels, in_size, out_size)))
    a_b = np.ascontiguousarray(np.broadcast_to(a, (channels, out_size, in_size)))
    return a_t_b, a_b


def _crop_offsets(h: int, w: int, crop: int):
    # torchvision center_crop formula (crop <= image assumed).
    # TODO(synk): torchvision pads when crop > image; not reproduced (never hit
    # with the min-over-all-dims crop sizes of the original module).
    return int(round((h - crop) / 2.0)), int(round((w - crop) / 2.0))


@functools.partial(jax.jit, static_argnums=(1, 2, 3, 4))
def _multicrop_impl(img, crop_l: int, out_l: int, crop_s: int, out_s: int):
    c, h, w = img.shape
    top_l, left_l = _crop_offsets(h, w, crop_l)
    top_s, left_s = _crop_offsets(h, w, crop_s)
    al_t, al = _resize_weights(crop_l, out_l, c)
    as_t, as_ = _resize_weights(crop_s, out_s, c)

    kernel = functools.partial(
        _multicrop_kernel, crop_l=crop_l, crop_s=crop_s,
        top_l=top_l, left_l=left_l, top_s=top_s, left_s=left_s)

    vmem = pl.BlockSpec(memory_space=pltpu.MemorySpace.VMEM)
    large, small = pl.pallas_call(
        kernel,
        out_shape=(
            jax.ShapeDtypeStruct((c, out_l, out_l), img.dtype),
            jax.ShapeDtypeStruct((c, out_s, out_s), img.dtype),
        ),
        in_specs=[vmem, vmem, vmem, vmem, vmem],
        out_specs=(vmem, vmem),
    )(img, jnp.asarray(al_t), jnp.asarray(al), jnp.asarray(as_t), jnp.asarray(as_))
    return large, small


class MultiCropPallas:
    """JAX/Pallas port of MultiCrop: returns a list of resized center crops."""

    def __init__(self, large_crop_size, num_large_crops, small_crop_size, num_small_crops):
        self.large_crop_size = large_crop_size
        self.num_large_crops = num_large_crops
        self.small_crop_size = small_crop_size
        self.num_small_crops = num_small_crops

    def __call__(self, img: jnp.ndarray):
        # Matches `min(img.size())` in the torch module: min over ALL dims,
        # including channels.
        # TODO(synk): upstream likely intended min(H, W); reproduced faithfully.
        min_dim = min(img.shape)
        large, small = _multicrop_impl(
            img, min_dim - 1, self.large_crop_size,
            min_dim // 2, self.small_crop_size,
        )
        # Center crop + bilinear resize is deterministic (no RNG in the
        # original), so every large crop is identical and every small crop is
        # identical: compute each once and replicate the references.
        return [large] * self.num_large_crops + [small] * self.num_small_crops


def _reference_crop_and_resize(img_np: np.ndarray, crop: int, out_size: int) -> np.ndarray:
    c, h, w = img_np.shape
    top, left = _crop_offsets(h, w, crop)
    x = img_np[:, top:top + crop, left:left + crop].astype(np.float64)
    a = _bilinear_matrix(crop, out_size)
    return np.einsum("oh,chw,nw->con", a, x, a).astype(np.float32)


if __name__ == "__main__":
    key = jax.random.PRNGKey(0)
    # layout: CHW single image tensor, C=4, H=W=16
    img = jax.random.uniform(key, (4, 16, 16), dtype=jnp.float32)

    mc = MultiCropPallas(large_crop_size=8, num_large_crops=2,
                         small_crop_size=4, num_small_crops=3)
    crops = mc(img)
    crops = [jax.block_until_ready(cr) for cr in crops]

    # Sanity check against a plain-numpy (float64) reference of the same math.
    # Tolerance reflects DEFAULT (bf16-pass) MXU precision instead of HIGHEST.
    min_dim = min(img.shape)
    img_np = np.asarray(img)
    refs = ([_reference_crop_and_resize(img_np, min_dim - 1, 8)] * 2
            + [_reference_crop_and_resize(img_np, min_dim // 2, 4)] * 3)
    for got, want in zip(crops, refs):
        assert got.shape == want.shape, (got.shape, want.shape)
        np.testing.assert_allclose(np.asarray(got), want, rtol=2e-2, atol=2e-2)

    print("KERNEL_OK")
</pallas_src>

<mosaic_0001>
module attributes {stable_mosaic.version = 11 : i64} {
  func.func @_multicrop_kernel(%arg0: memref<4x16x16xf32, #tpu.memory_space<vmem>>, %arg1: memref<4x3x8xf32, #tpu.memory_space<vmem>>, %arg2: memref<4x8x3xf32, #tpu.memory_space<vmem>>, %arg3: memref<4x2x4xf32, #tpu.memory_space<vmem>>, %arg4: memref<4x4x2xf32, #tpu.memory_space<vmem>>, %arg5: memref<4x8x8xf32, #tpu.memory_space<vmem>>, %arg6: memref<4x4x4xf32, #tpu.memory_space<vmem>>) attributes {dimension_semantics = [], scalar_prefetch = 0 : i64, scratch_operands = 0 : i64, tpu.core_type = #tpu.core_type<tc>} {
    %c0 = arith.constant 0 : index
    %c6 = arith.constant 6 : index
    %c6_0 = arith.constant 6 : index
    %0 = vector.load %arg0[%c0, %c6, %c6_0] : memref<4x16x16xf32, #tpu.memory_space<vmem>>, vector<4x3x3xf32>
    %c0_1 = arith.constant 0 : index
    %c0_2 = arith.constant 0 : index
    %c0_3 = arith.constant 0 : index
    %1 = vector.load %arg1[%c0_1, %c0_2, %c0_3] : memref<4x3x8xf32, #tpu.memory_space<vmem>>, vector<4x3x8xf32>
    "tpu.trace_start"() <{level = 10 : i32, message = "cyx,cxo->cyo"}> : () -> ()
    %cst = arith.constant dense<0.000000e+00> : vector<4x3x8xf32>
    %2 = tpu.matmul %0, %1, %cst {dimension_numbers = #tpu.dot_dimension_numbers<[2], [1], [1], [2], [0, 0, 0, 1, 1, 2], [0], [0]>} : vector<4x3x3xf32>, vector<4x3x8xf32>, vector<4x3x8xf32> -> vector<4x3x8xf32>
    "tpu.trace_stop"() : () -> ()
    %c0_4 = arith.constant 0 : index
    %c0_5 = arith.constant 0 : index
    %c0_6 = arith.constant 0 : index
    %3 = vector.load %arg2[%c0_4, %c0_5, %c0_6] : memref<4x8x3xf32, #tpu.memory_space<vmem>>, vector<4x8x3xf32>
    "tpu.trace_start"() <{level = 10 : i32, message = "cji,cio->cjo"}> : () -> ()
    %cst_7 = arith.constant dense<0.000000e+00> : vector<4x8x8xf32>
    %4 = tpu.matmul %3, %2, %cst_7 {dimension_numbers = #tpu.dot_dimension_numbers<[2], [1], [1], [2], [0, 0, 0, 1, 1, 2], [0], [0]>} : vector<4x8x3xf32>, vector<4x3x8xf32>, vector<4x8x8xf32> -> vector<4x8x8xf32>
    "tpu.trace_stop"() : () -> ()
    %c0_8 = arith.constant 0 : index
    %c0_9 = arith.constant 0 : index
    %c0_10 = arith.constant 0 : index
    %5 = vector.load %arg5[%c0_8, %c0_9, %c0_10] : memref<4x8x8xf32, #tpu.memory_space<vmem>>, vector<4x8x8xf32>
    tpu.vector_store %arg5[%c0_8, %c0_9, %c0_10], %4 {strides = array<i32>} : memref<4x8x8xf32, #tpu.memory_space<vmem>>, vector<4x8x8xf32>,
    %c0_11 = arith.constant 0 : index
    %c7 = arith.constant 7 : index
    %c7_12 = arith.constant 7 : index
    %6 = vector.load %arg0[%c0_11, %c7, %c7_12] : memref<4x16x16xf32, #tpu.memory_space<vmem>>, vector<4x2x2xf32>
    %c0_13 = arith.constant 0 : index
    %c0_14 = arith.constant 0 : index
    %c0_15 = arith.constant 0 : index
    %7 = vector.load %arg3[%c0_13, %c0_14, %c0_15] : memref<4x2x4xf32, #tpu.memory_space<vmem>>, vector<4x2x4xf32>
    "tpu.trace_start"() <{level = 10 : i32, message = "cyx,cxo->cyo"}> : () -> ()
    %cst_16 = arith.constant dense<0.000000e+00> : vector<4x2x4xf32>
    %8 = tpu.matmul %6, %7, %cst_16 {dimension_numbers = #tpu.dot_dimension_numbers<[2], [1], [1], [2], [0, 0, 0, 1, 1, 2], [0], [0]>} : vector<4x2x2xf32>, vector<4x2x4xf32>, vector<4x2x4xf32> -> vector<4x2x4xf32>
    "tpu.trace_stop"() : () -> ()
    %c0_17 = arith.constant 0 : index
    %c0_18 = arith.constant 0 : index
    %c0_19 = arith.constant 0 : index
    %9 = vector.load %arg4[%c0_17, %c0_18, %c0_19] : memref<4x4x2xf32, #tpu.memory_space<vmem>>, vector<4x4x2xf32>
    "tpu.trace_start"() <{level = 10 : i32, message = "cji,cio->cjo"}> : () -> ()
    %cst_20 = arith.constant dense<0.000000e+00> : vector<4x4x4xf32>
    %10 = tpu.matmul %9, %8, %cst_20 {dimension_numbers = #tpu.dot_dimension_numbers<[2], [1], [1], [2], [0, 0, 0, 1, 1, 2], [0], [0]>} : vector<4x4x2xf32>, vector<4x2x4xf32>, vector<4x4x4xf32> -> vector<4x4x4xf32>
    "tpu.trace_stop"() : () -> ()
    %c0_21 = arith.constant 0 : index
    %c0_22 = arith.constant 0 : index
    %c0_23 = arith.constant 0 : index
    %11 = vector.load %arg6[%c0_21, %c0_22, %c0_23] : memref<4x4x4xf32, #tpu.memory_space<vmem>>, vector<4x4x4xf32>
    tpu.vector_store %arg6[%c0_21, %c0_22, %c0_23], %10 {strides = array<i32>} : memref<4x4x4xf32, #tpu.memory_space<vmem>>, vector<4x4x4xf32>,
    return
  }
}

</mosaic_0001>

<bundles_post_ra>
// kernel: _multicrop_impl.1
= control target key start
LH: loop header
LB: loop body
LE: loop exit
PB: predicated region body
PF: predicated region fallthrough
CT: control target
= control target key end

     0   :  { %12 = vsyncpa [#allocation3], 0  ;;  %s1879_s0 = inlined_call_operand.hbm [shape: f32[4,16,16], index: 0, kind: input, shape index: {}]   ;;  %s1880_s1 = inlined_call_operand.hbm [shape: f32[4,3,8], index: 1, kind: input, shape index: {}]   ;;  %s1881_s2 = inlined_call_operand.hbm [shape: f32[4,8,3], index: 2, kind: input, shape index: {}]   ;;  %s1882_s3 = inlined_call_operand.hbm [shape: f32[4,2,4], index: 3, kind: input, shape index: {}]   ;;  %s1883_s4 = inlined_call_operand.hbm [shape: f32[4,4,2], index: 4, kind: input, shape index: {}]   ;;  %s1884_s5 = inlined_call_operand.hbm [shape: f32[4,8,8], index: 5, kind: output, shape index: {0}]   ;;  %s1885_s6 = inlined_call_operand.hbm [shape: f32[4,4,4], index: 6, kind: output, shape index: {1}]  }
   0x1   :  { %13 = vsyncpa [#allocation6], 0 }
   0x2   :  { %14 = vsyncpa [#allocation9], 0 }
   0x3   :  { %15 = vsyncpa [#allocation4], 0 }
   0x4   :  { %16 = vsyncpa [#allocation13], 0  ;;  %s1708_s21 = smov [#allocation5]  }
   0x5   :  { %s34_s22 = sshll.u32 %s1708_s21, 4  ;;  %s35_s22 = int_to_ptr.vmem [resolvable:$true] %s34_s22 }
   0x6   :  { %s1566_s23 = scalar_lea.vmem %s35_s22, 256  ;;  %p1571_p1 = scmp.lt.s32.totalorder %s35_s22, %s35_s22 }
   0x7   :  { %p1567_p0 = scmp.ne.s32.totalorder %s35_s22, %s1566_s23  ;;  %p1572_p2 = scmp.lt.s32.totalorder %s1566_s23, %s1566_s23 }
   0x9   :  { %p1573_p3 = por %p1572_p2, %p1571_p1 }
   0xb   :  { %p1574_p4 = pnand %p1573_p3, %p1567_p0 }
   0xd   :  { %1577 = shalt.err (!%p1574_p4)
}
   0xe   :  { %s1709_s24 = smov 64   ;;  %s1710_s25 = smov 4  }
   0xf   :  { %40 = dma.hbm_to_vmem [thread:$0]  %s1880_s1, 256, %s35_s22, [#allocation6], %s1709_s24, %s1709_s24, %s1710_s25  }
  0x10   :  { %s1711_s28 = smov [#allocation8]  }
  0x11   :  { %s58_s29 = sshll.u32 %s1711_s28, 4  ;;  %s59_s29 = int_to_ptr.vmem [resolvable:$true] %s58_s29 }
  0x12   :  { %s1586_s30 = scalar_lea.vmem %s59_s29, 128  ;;  %p1591_p6 = scmp.lt.s32.totalorder %s59_s29, %s59_s29 }
  0x13   :  { %p1587_p5 = scmp.ne.s32.totalorder %s59_s29, %s1586_s30  ;;  %p1592_p7 = scmp.lt.s32.totalorder %s1586_s30, %s1586_s30 }
  0x15   :  { %p1593_p8 = por %p1592_p7, %p1591_p6 }
  0x17   :  { %p1594_p9 = pnand %p1593_p8, %p1587_p5 }
  0x19   :  { %1597 = shalt.err (!%p1594_p9)
}
  0x1a   :  { %s1712_s7 = smov 32   ;;  %s1713_s8 = smov 2  }
  0x1b   :  { %64 = dma.hbm_to_vmem [thread:$0]  %s1882_s3, 128, %s59_s29, [#allocation9], %s1712_s7, %s1712_s7, %s1713_s8  }
  0x1c   :  { %s1714_s11 = smov [#allocation2]  }
  0x1d   :  { %s22_s12 = sshll.u32 %s1714_s11, 4  ;;  %s23_s12 = int_to_ptr.vmem [resolvable:$true] %s22_s12 }
  0x1e   :  { %s1606_s1 = scalar_lea.vmem %s23_s12, 1024  ;;  %p1611_p11 = scmp.lt.s32.totalorder %s23_s12, %s23_s12 }
  0x1f   :  { %p1607_p10 = scmp.ne.s32.totalorder %s23_s12, %s1606_s1  ;;  %p1612_p12 = scmp.lt.s32.totalorder %s1606_s1, %s1606_s1 }
  0x21   :  { %p1613_p13 = por %p1612_p12, %p1611_p11 }
  0x23   :  { %p1614_p0 = pnand %p1613_p13, %p1607_p10 }
  0x25   :  { %1617 = shalt.err (!%p1614_p0)
}
  0x26   :  { %s1715_s13 = smov 128   ;;  %s1716_s14 = smov 8  }
  0x27   :  { %28 = dma.hbm_to_vmem [thread:$0]  %s1879_s0, 1024, %s23_s12, [#allocation3], %s1715_s13, %s1715_s13, %s1716_s14  }
  0x28   :  { %s1717_s3 = smov [#allocation7]   ;;  %s1718_s18 = smov [#allocation10]  }
  0x29   :  { %s46_s17 = sshll.u32 %s1717_s3, 4  ;;  %s70_s19 = sshll.u32 %s1718_s18, 4  ;;  %s47_s17 = int_to_ptr.vmem [resolvable:$true] %s46_s17  ;;  %s71_s19 = int_to_ptr.vmem [resolvable:$true] %s70_s19 }
  0x2a   :  { %s1626_s20 = scalar_lea.vmem %s47_s17, 512  ;;  %p1631_p2 = scmp.lt.s32.totalorder %s47_s17, %s47_s17 }
  0x2b   :  { %p1627_p1 = scmp.ne.s32.totalorder %s47_s17, %s1626_s20  ;;  %p1632_p3 = scmp.lt.s32.totalorder %s1626_s20, %s1626_s20 }
  0x2d   :  { %p1633_p4 = por %p1632_p3, %p1631_p2 }
  0x2f   :  { %p1634_p5 = pnand %p1633_p4, %p1627_p1 }
  0x31   :  { %1637 = shalt.err (!%p1634_p5)
}
  0x32   :  { %52 = dma.hbm_to_vmem [thread:$0]  %s1881_s2, 512, %s47_s17, [#allocation6], %s1715_s13, %s1715_s13, %s1716_s14  }
  0x33   :  { %s1646_s0 = scalar_lea.vmem %s71_s19, 256  ;;  %p1651_p7 = scmp.lt.s32.totalorder %s71_s19, %s71_s19 }
  0x34   :  { %p1647_p6 = scmp.ne.s32.totalorder %s71_s19, %s1646_s0  ;;  %p1652_p8 = scmp.lt.s32.totalorder %s1646_s0, %s1646_s0 }
  0x36   :  { %p1653_p9 = por %p1652_p8, %p1651_p7 }
  0x38   :  { %p1654_p10 = pnand %p1653_p9, %p1647_p6 }
  0x3a   :  { %1657 = shalt.err (!%p1654_p10)
}
  0x3b   :  { %76 = dma.hbm_to_vmem [thread:$0]  %s1883_s4, 256, %s71_s19, [#allocation9], %s1709_s24, %s1709_s24, %s1710_s25  }
  0x3c   :  { %1698 = dma.done.wait [#allocation3], 1024  }
  0x3d   :  { %1699 = vsyncadd [#allocation3], 4294966272 }
  0x3e   :  { %1700 = dma.done.wait [#allocation6], 768  }
  0x3f   :  { %1701 = vsyncadd [#allocation6], 4294966528 }
  0x40   :  { %1702 = dma.done.wait [#allocation9], 384  }
  0x41   :  { %1703 = vsyncadd [#allocation9], 4294966912  ;;  %v1719_v0 = vmov 0.0   ;;  %vm1720_vm0 = vmmov 0   ;;  %vm106_vm1 = vcmask 1042432   ;;  %s1721_s2 = smov 122  }
  0x42   :  { %1461 = vmatprep.subr.mxu0 %v1719_v0  ;;  %1463 = vmatprep.mubr.msk.f32.mxu0 %vm1720_vm0, %v1719_v0  ;;  %v92_v1 = vld [vmem:[#allocation2 + $0x6] sm:$0x7]  ;;  %v96_v3 = vld [vmem:[#allocation5] sm:$0x7]  ;;  %v93_v5 = vld [vmem:[#allocation2 + $0x16] sm:$0x7] }
  0x43   :  { %1466 = vmatprep.subr.mxu1 %v1719_v0  ;;  %1468 = vmatprep.mubr.msk.f32.mxu1 %vm1720_vm0, %v1719_v0  ;;  %v94_v2 = vld [vmem:[#allocation2 + $0x26] sm:$0x7]  ;;  %v95_v6 = vld [vmem:[#allocation2 + $0x36] sm:$0x7]  ;;  %s1722_s4 = smov 121   ;;  %vm103_vm2 = vcmask 23552  }
  0x44   :  { %101 = vrot.lane.b32.xlu0 %v92_v1, %s1721_s2  ;;  %259 = vrot.lane.b32.xlu1 %v94_v2, %s1721_s2  ;;  %v97_v4 = vld [vmem:[#allocation5 + $0x4] sm:$0x7]  ;;  %v727_v7 = vld [vmem:[#allocation2 + $0x7] sm:$0x3]  ;;  %v728_v8 = vld [vmem:[#allocation2 + $0x17] sm:$0x3] }
  0x45   :  { %1462 = vmatpush3.msk.msra.mxu0 %vm106_vm1, %v96_v3  ;;  %1467 = vmatpush3.msk.msra.mxu1 %vm106_vm1, %v97_v4  ;;  %v729_v9 = vld [vmem:[#allocation2 + $0x27] sm:$0x3]  ;;  %v730_v10 = vld [vmem:[#allocation2 + $0x37] sm:$0x3]  ;;  %v99_v14 = vld [vmem:[#allocation5 + $0xc] sm:$0x7] }
  0x46   :  { %1471 = vmatprep.subr.mxu0 %v1719_v0  ;;  %1476 = vmatprep.subr.mxu1 %v1719_v0  ;;  %v98_v11 = vld [vmem:[#allocation5 + $0x8] sm:$0x7]  ;;  %v414_v17 = vld [vmem:[#allocation7] sm:$0xff]  ;;  %v415_v20 = vld [vmem:[#allocation7 + $0x8] sm:$0xff]  ;;  %vm741_vm3 = vcmask 1041408   ;;  %vm738_vm4 = vcmask 15360  }
  0x47   :  { %v416_v21 = vld [vmem:[#allocation7 + $0x10] sm:$0xff]  ;;  %v731_v27 = vld [vmem:[#allocation8] sm:$0x3]  ;;  %v417_v28 = vld [vmem:[#allocation7 + $0x18] sm:$0xff]  ;;  %vm722_vm5 = vcmask 64512   ;;  %s1723_s27 = smov [#allocation11]  }
  0x48   :  { %181 = vrot.lane.b32.xlu0 %v93_v5, %s1721_s2  ;;  %337 = vrot.lane.b32.xlu1 %v95_v6, %s1721_s2  ;;  %v732_v31 = vld [vmem:[#allocation8 + $0x2] sm:$0x3]  ;;  %v733_v33 = vld [vmem:[#allocation8 + $0x4] sm:$0x3]  ;;  %v734_v35 = vld [vmem:[#allocation8 + $0x6] sm:$0x3] }
  0x49   :  { %v1049_v43 = vld [vmem:[#allocation10] sm:$0xf]  ;;  %v1050_v48 = vld [vmem:[#allocation10 + $0x4] sm:$0xf]  ;;  %v1051_v51 = vld [vmem:[#allocation10 + $0x8] sm:$0xf] }
  0x4a   :  { %v1052_v54 = vld [vmem:[#allocation10 + $0xc] sm:$0xf]  ;;  %s1367_s28 = sshll.u32 %s1723_s27, 4  ;;  %s1368_s28 = int_to_ptr.vmem [resolvable:$true] %s1367_s28 }
  0x4b   :  { %s1658_s29 = scalar_lea.vmem %s1368_s28, 512  ;;  %p1663_p12 = scmp.lt.s32.totalorder %s1368_s28, %s1368_s28 }
  0x4c   :  { %736 = vrot.lane.b32.xlu0 %v727_v7, %s1722_s4  ;;  %816 = vrot.lane.b32.xlu1 %v728_v8, %s1722_s4  ;;  %p1659_p11 = scmp.ne.s32.totalorder %s1368_s28, %s1658_s29  ;;  %p1664_p13 = scmp.lt.s32.totalorder %s1658_s29, %s1658_s29 }
  0x4e   :  { %p1665_p0 = por %p1664_p13, %p1663_p12 }
  0x50   :  { %894 = vrot.lane.b32.xlu0 %v729_v9, %s1722_s4  ;;  %972 = vrot.lane.b32.xlu1 %v730_v10, %s1722_s4  ;;  %p1666_p1 = pnand %p1665_p0, %p1659_p11 }
  0xb6   :  { %v102_v12 = vpop.permute.xlu0 %101  ;;  %v260_v13 = vpop.permute.xlu1 %259 }
  0xb7   :  { %1464 = vmatmul.mubr.msk.f32.vlgmr.msra.gmra.mxu0 %vm103_vm2, %v102_v12 }
  0xb8   :  { %1472 = vmatpush3.msk.msra.mxu0 %vm106_vm1, %v98_v11  ;;  %1473 = vmatprep.mubr.msk.f32.mxu0 %vm1720_vm0, %v1719_v0 }
  0xb9   :  { %1481 = vmatprep.subr.mxu0 %v1719_v0 }
  0xba   :  { %v182_v15 = vpop.permute.xlu0 %181  ;;  %v338_v16 = vpop.permute.xlu1 %337 }
  0xbb   :  { %1469 = vmatmul.mubr.msk.f32.vlgmr.msra.gmra.mxu1 %vm103_vm2, %v182_v15  ;;  %1474 = vmatmul.mubr.msk.f32.vlgmr.msra.gmra.mxu0 %vm103_vm2, %v260_v13 }
  0xbc   :  { %1477 = vmatpush3.msk.msra.mxu1 %vm106_vm1, %v99_v14  ;;  %1478 = vmatprep.mubr.msk.f32.mxu1 %vm1720_vm0, %v1719_v0 }
  0xbd   :  { %1483 = vmatprep.mubr.msk.f32.mxu0 %vm1720_vm0, %v1719_v0  ;;  %1486 = vmatprep.subr.mxu1 %v1719_v0 }
  0xbe   :  { %v737_v24 = vpop.permute.xlu0 %736  ;;  %v817_v30 = vpop.permute.xlu1 %816 }
  0xbf   :  { %1479 = vmatmul.mubr.msk.f32.vlgmr.msra.gmra.mxu1 %vm103_vm2, %v338_v16 }
  0xc0   :  { %1488 = vmatprep.mubr.msk.f32.mxu1 %vm1720_vm0, %v1719_v0 }
  0xc2   :  { %v895_v34 = vpop.permute.xlu0 %894  ;;  %v973_v36 = vpop.permute.xlu1 %972 }
 0x177   :  { %v176_v18 = vpop.f32.mrf.mxu0 }
 0x178   :  { %1482 = vmatpush3.msk.msra.mxu0 %vm106_vm1, %v176_v18 }
 0x179   :  { %v1465_v19 = vpop.f32.mrf.mxu0  ;;  %1484 = vmatmul.mubr.msk.f32.vlgmr.msra.gmra.mxu0 %vm103_vm2, %v414_v17  ;;  %1491 = vmatprep.subr.mxu0 %v1719_v0 }
 0x17a   :  { %1493 = vmatprep.mubr.msk.f32.mxu0 %vm1720_vm0, %v1719_v0 }
 0x17b   :  { %v254_v22 = vpop.f32.mrf.mxu1  ;;  %v332_v23 = vpop.f32.mrf.mxu0 }
 0x17c   :  { %1487 = vmatpush3.msk.msra.mxu1 %vm106_vm1, %v254_v22  ;;  %1492 = vmatpush3.msk.msra.mxu0 %vm106_vm1, %v332_v23 }
 0x17d   :  { %v1470_v25 = vpop.f32.mrf.mxu1  ;;  %v1475_v26 = vpop.f32.mrf.mxu0  ;;  %1489 = vmatmul.mubr.msk.f32.vlgmr.msra.gmra.mxu1 %vm103_vm2, %v415_v20  ;;  %1494 = vmatmul.mubr.msk.f32.vlgmr.msra.gmra.mxu0 %vm103_vm2, %v416_v21 }
 0x17e   :  { %1496 = vmatprep.subr.mxu1 %v1719_v0  ;;  %1498 = vmatprep.mubr.msk.f32.mxu1 %vm1720_vm0, %v1719_v0 }
 0x17f   :  { %v410_v29 = vpop.f32.mrf.mxu1  ;;  %1501 = vmatprep.subr.mxu0 %v1719_v0  ;;  %1503 = vmatprep.mubr.msk.f32.mxu0 %vm1720_vm0, %v1719_v0 }
 0x180   :  { %1497 = vmatpush3.msk.msra.mxu1 %vm106_vm1, %v410_v29  ;;  %1502 = vmatpush3.msk.msra.mxu0 %vm741_vm3, %v731_v27 }
 0x181   :  { %v1480_v32 = vpop.f32.mrf.mxu1  ;;  %1499 = vmatmul.mubr.msk.f32.vlgmr.msra.gmra.mxu1 %vm103_vm2, %v417_v28  ;;  %1504 = vmatmul.mubr.msk.f32.vlgmr.msra.gmra.mxu0 %vm738_vm4, %v737_v24 }
 0x182   :  { %1506 = vmatprep.subr.mxu1 %v1719_v0  ;;  %1508 = vmatprep.mubr.msk.f32.mxu1 %vm1720_vm0, %v1719_v0 }
 0x183   :  { %1507 = vmatpush3.msk.msra.mxu1 %vm741_vm3, %v732_v31  ;;  %1511 = vmatprep.subr.mxu0 %v1719_v0 }
 0x184   :  { %1512 = vmatpush3.msk.msra.mxu0 %vm741_vm3, %v733_v33  ;;  %1513 = vmatprep.mubr.msk.f32.mxu0 %vm1720_vm0, %v1719_v0 }
 0x185   :  { %1509 = vmatmul.mubr.msk.f32.vlgmr.msra.gmra.mxu1 %vm738_vm4, %v817_v30  ;;  %1514 = vmatmul.mubr.msk.f32.vlgmr.msra.gmra.mxu0 %vm738_vm4, %v895_v34 }
 0x186   :  { %1516 = vmatprep.subr.mxu1 %v1719_v0  ;;  %1518 = vmatprep.mubr.msk.f32.mxu1 %vm1720_vm0, %v1719_v0 }
 0x187   :  { %1517 = vmatpush3.msk.msra.mxu1 %vm741_vm3, %v734_v35  ;;  %1521 = vmatprep.subr.mxu0 %v1719_v0 }
 0x188   :  { %1526 = vmatprep.subr.mxu1 %v1719_v0  ;;  %1523 = vmatprep.mubr.msk.f32.mxu0 %vm1720_vm0, %v1719_v0 }
 0x189   :  { %1519 = vmatmul.mubr.msk.f32.vlgmr.msra.gmra.mxu1 %vm738_vm4, %v973_v36 }
 0x18a   :  { %1528 = vmatprep.mubr.msk.f32.mxu1 %vm1720_vm0, %v1719_v0 }
 0x239   :  { %v490_v37 = vpop.f32.mrf.mxu0 }
 0x23a   :  { %723 = vst.msk [vmem:[#allocation11] sm:$0xff] %vm722_vm5, %v490_v37 }
 0x23b   :  { %v1485_v38 = vpop.f32.mrf.mxu0 }
 0x23d   :  { %v566_v39 = vpop.f32.mrf.mxu1  ;;  %v642_v40 = vpop.f32.mrf.mxu0 }
 0x23e   :  { %724 = vst.msk [vmem:[#allocation11 + $0x8] sm:$0xff] %vm722_vm5, %v566_v39  ;;  %725 = vst.msk [vmem:[#allocation11 + $0x10] sm:$0xff] %vm722_vm5, %v642_v40 }
 0x23f   :  { %v1490_v41 = vpop.f32.mrf.mxu1  ;;  %v1495_v42 = vpop.f32.mrf.mxu0 }
 0x241   :  { %v718_v44 = vpop.f32.mrf.mxu1  ;;  %v811_v45 = vpop.f32.mrf.mxu0 }
 0x242   :  { %726 = vst.msk [vmem:[#allocation11 + $0x18] sm:$0xff] %vm722_vm5, %v718_v44  ;;  %1522 = vmatpush3.msk.msra.mxu0 %vm741_vm3, %v811_v45 }
 0x243   :  { %v1500_v46 = vpop.f32.mrf.mxu1  ;;  %v1505_v47 = vpop.f32.mrf.mxu0  ;;  %1524 = vmatmul.mubr.msk.f32.vlgmr.msra.gmra.mxu0 %vm738_vm4, %v1049_v43  ;;  %1531 = vmatprep.subr.mxu0 %v1719_v0 }
 0x244   :  { %1533 = vmatprep.mubr.msk.f32.mxu0 %vm1720_vm0, %v1719_v0 }
 0x245   :  { %v889_v49 = vpop.f32.mrf.mxu1  ;;  %v967_v50 = vpop.f32.mrf.mxu0 }
 0x246   :  { %1527 = vmatpush3.msk.msra.mxu1 %vm741_vm3, %v889_v49  ;;  %1532 = vmatpush3.msk.msra.mxu0 %vm741_vm3, %v967_v50 }
 0x247   :  { %v1510_v52 = vpop.f32.mrf.mxu1  ;;  %1529 = vmatmul.mubr.msk.f32.vlgmr.msra.gmra.mxu1 %vm738_vm4, %v1050_v48  ;;  %v1515_v53 = vpop.f32.mrf.mxu0  ;;  %1536 = vmatprep.subr.mxu1 %v1719_v0 }
 0x248   :  { %1538 = vmatprep.mubr.msk.f32.mxu1 %vm1720_vm0, %v1719_v0  ;;  %1534 = vmatmul.mubr.msk.f32.vlgmr.msra.gmra.mxu0 %vm738_vm4, %v1051_v51 }
 0x249   :  { %v1045_v55 = vpop.f32.mrf.mxu1 }
 0x24a   :  { %1537 = vmatpush3.msk.msra.mxu1 %vm741_vm3, %v1045_v55 }
 0x24b   :  { %v1520_v56 = vpop.f32.mrf.mxu1  ;;  %1539 = vmatmul.mubr.msk.f32.vlgmr.msra.gmra.mxu1 %vm738_vm4, %v1052_v54 }
 0x24c   :  { %1669 = shalt.err (!%p1666_p1)
}
 0x24d   :  { %1373 = dma.vmem_to_hbm [thread:$0]  %s1368_s28, 512, %s1884_s5, [#allocation4], %s1715_s13, %s1715_s13, %s1716_s14   ;;  %vm1357_vm6 = vcmask 27648  }
 0x24e   :  { %s1724_s8 = smov [#allocation12]  }
 0x24f   :  { %s1379_s9 = sshll.u32 %s1724_s8, 4  ;;  %s1380_s9 = int_to_ptr.vmem [resolvable:$true] %s1379_s9 }
 0x250   :  { %s1678_s10 = scalar_lea.vmem %s1380_s9, 256  ;;  %p1683_p3 = scmp.lt.s32.totalorder %s1380_s9, %s1380_s9 }
 0x251   :  { %p1679_p2 = scmp.ne.s32.totalorder %s1380_s9, %s1678_s10  ;;  %p1684_p4 = scmp.lt.s32.totalorder %s1678_s10, %s1678_s10 }
 0x253   :  { %p1685_p5 = por %p1684_p4, %p1683_p3 }
 0x255   :  { %p1686_p6 = pnand %p1685_p5, %p1679_p2 }
 0x303   :  { %v1125_v57 = vpop.f32.mrf.mxu0 }
 0x304   :  { %1358 = vst.msk [vmem:[#allocation12] sm:$0xf] %vm1357_vm6, %v1125_v57 }
 0x305   :  { %v1525_v58 = vpop.f32.mrf.mxu0 }
 0x307   :  { %v1201_v59 = vpop.f32.mrf.mxu1 }
 0x308   :  { %1359 = vst.msk [vmem:[#allocation12 + $0x4] sm:$0xf] %vm1357_vm6, %v1201_v59  ;;  %v1277_v60 = vpop.f32.mrf.mxu0 }
 0x309   :  { %v1530_v61 = vpop.f32.mrf.mxu1  ;;  %1360 = vst.msk [vmem:[#allocation12 + $0x8] sm:$0xf] %vm1357_vm6, %v1277_v60 }
 0x30a   :  { %v1535_v62 = vpop.f32.mrf.mxu0 }
 0x30b   :  { %v1353_v63 = vpop.f32.mrf.mxu1 }
 0x30c   :  { %1361 = vst.msk [vmem:[#allocation12 + $0xc] sm:$0xf] %vm1357_vm6, %v1353_v63 }
 0x30d   :  { %v1540_v0 = vpop.f32.mrf.mxu1 }
 0x30e   :  { %1689 = shalt.err (!%p1686_p6)
}
 0x30f   :  { %1385 = dma.vmem_to_hbm [thread:$0]  %s1380_s9, 256, %s1885_s6, [#allocation13], %s1709_s24, %s1709_s24, %s1710_s25  }
 0x310   :  { %1704 = dma.done.wait [#allocation4], 512  }
 0x311   :  { %1705 = vsyncadd [#allocation4], 4294966784 }
 0x312   :  { %1706 = dma.done.wait [#allocation13], 256  }
 0x313   :  { %1707 = vsyncadd [#allocation13], 4294967040 }
 0x314   :  { %1392 = vsyncpa [#allocation3], 1 }
 0x315   :  { %1393 = vsyncpa [#allocation6], 1 }
 0x316   :  { %1394 = vsyncpa [#allocation9], 1 }
 0x317   :  { %1395 = vsyncpa [#allocation4], 1 }
 0x318   :  { %1396 = vsyncpa [#allocation13], 1 }

</bundles_post_ra>
